<compile_context>
chip_gen: v6e
topology: v6e:2x2x1
jax: 0.10.0
libtpu: 0.0.40
codegen_flags: <defaults>
</compile_context>

<pallas_src>
import jax
import jax.numpy as jnp
from jax.experimental import pallas as pl
from jax.experimental.pallas import tpu as pltpu


def _round_up(n: int, m: int) -> int:
    return ((n + m - 1) // m) * m


def _cdiv(a: int, b: int) -> int:
    return (a + b - 1) // b


def _vmem_capacity_bytes() -> int:
    """Physical VMEM per TensorCore; conservative (v7x-like) fallback."""
    try:
        return int(pltpu.get_tpu_info().vmem_capacity_bytes)
    except Exception:
        return 64 * 1024 * 1024


def _choose_tiles(R: int, T: int, itemsize: int):
    """Pick (Rt, Tt, vmem_limit) per TPU generation."""
    # Packed sublane tile for sub-32-bit dtypes.
    sub = 8 if itemsize >= 4 else (16 if itemsize == 2 else 32)

    vmem = _vmem_capacity_bytes()
    big_vmem = vmem >= 100 * 1024 * 1024  # v5e / v6e (128 MiB); v7x has 64 MiB/TC
    if big_vmem:
        row_cap, t_cap = 1024, 2048            # <=32 MiB double-buffered f32 in+out
        vmem_limit = 64 * 1024 * 1024
        min_blocks = 1                          # single TC: no need to split
    else:
        row_cap, t_cap = 512, 1024              # keep working set small on 64 MiB VMEM
        vmem_limit = 32 * 1024 * 1024
        min_blocks = 4                          # keep both v7x TensorCores busy

    Rt = min(row_cap, _round_up(R, sub))
    Tt = min(t_cap, _round_up(T, 128))

    # Ensure enough blocks along the "parallel" grid axes (v7x megacore sharding).
    while _cdiv(R, Rt) * _cdiv(T, Tt) < min_blocks:
        if Tt >= 256:
            Tt = _round_up(Tt // 2, 128)
        elif Rt >= 2 * sub:
            Rt = _round_up(Rt // 2, sub)
        else:
            break

    return Rt, Tt, vmem_limit


def _snake_kernel(x_ref, p_ref, o_ref):
    # x_ref: (Rt, Tt) tile of the flattened (B*C, T) input.
    # p_ref: (Rt, 2) f32 per-row params: [:,0] = alpha_eff, [:,1] = 1/(alpha_eff+1e-9).
    x = x_ref[...].astype(jnp.float32)          # compute in f32 even for bf16 I/O
    a = p_ref[:, 0:1]                           # (Rt, 1) broadcasts over lanes
    inv_a = p_ref[:, 1:2]
    s = jnp.sin(a * x)
    o_ref[...] = (x + inv_a * (s * s)).astype(o_ref.dtype)


def snake(x: jax.Array, alpha: jax.Array, alpha_logscale: bool = False) -> jax.Array:
    """Snake activation. x: (B, C, T), alpha: (C,). Matches the PyTorch module."""
    B, C, T = x.shape
    assert alpha.shape == (C,)

    # --- hoist per-channel transcendental / divide out of the kernel (f32) ---
    a32 = alpha.astype(jnp.float32)
    alpha_eff = jnp.exp(a32) if alpha_logscale else a32
    inv_a = 1.0 / (alpha_eff + 1e-9)             # 1e-9 guard matches the reference

    # --- flatten to 2D; pack per-row params into one (R, 2) array ---
    R = B * C
    x2 = x.reshape(R, T)
    params = jnp.tile(jnp.stack([alpha_eff, inv_a], axis=-1), (B, 1))  # (R, 2) f32

    itemsize = jnp.dtype(x.dtype).itemsize
    Rt, Tt, vmem_limit = _choose_tiles(R, T, itemsize)
    grid = (_cdiv(R, Rt), _cdiv(T, Tt))          # ragged edges handled by Pallas

    n_elem = R * T
    cost = pl.CostEstimate(
        flops=4 * n_elem,
        transcendentals=n_elem,
        bytes_accessed=2 * n_elem * itemsize + R * 2 * 4,
    )

    out2 = pl.pallas_call(
        _snake_kernel,
        out_shape=jax.ShapeDtypeStruct((R, T), x.dtype),
        grid_spec=pltpu.PrefetchScalarGridSpec(
            num_scalar_prefetch=0,
            grid=grid,
            in_specs=[
                pl.BlockSpec((Rt, Tt), lambda r, t: (r, t)),   # x tile (streamed)
                pl.BlockSpec((Rt, 2), lambda r, t: (r, 0)),    # packed per-row params
            ],
            out_specs=pl.BlockSpec((Rt, Tt), lambda r, t: (r, t)),
        ),
        compiler_params=pltpu.CompilerParams(
            dimension_semantics=("parallel", "parallel"),
            vmem_limit_bytes=vmem_limit,
        ),
        cost_estimate=cost,
    )(x2, params)

    return out2.reshape(B, C, T)


def snake_ref(x, alpha, alpha_logscale=False):
    a = alpha.astype(jnp.float32)[None, :, None]
    if alpha_logscale:
        a = jnp.exp(a)
    xf = x.astype(jnp.float32)
    y = xf + (1.0 / (a + 1e-9)) * jnp.sin(xf * a) ** 2
    return y.astype(x.dtype)


if __name__ == "__main__":
    key = jax.random.PRNGKey(0)
    k1, k2 = jax.random.split(key)

    # Case 1: small f32, linear alpha (parameter init: ones(C)).
    B, C, T = 2, 4, 16
    x = jax.random.normal(k1, (B, C, T), dtype=jnp.float32)
    alpha_lin = jnp.ones((C,), dtype=jnp.float32)
    out = jax.block_until_ready(snake(x, alpha_lin, alpha_logscale=False))
    ref = snake_ref(x, alpha_lin, alpha_logscale=False)
    assert out.shape == (B, C, T)
    assert jnp.allclose(out, ref, atol=1e-5, rtol=1e-5)

    # Case 2: alpha_logscale path (parameter init: zeros(C)).
    alpha_log = jnp.zeros((C,), dtype=jnp.float32)
    out_log = jax.block_until_ready(snake(x, alpha_log, alpha_logscale=True))
    ref_log = snake_ref(x, alpha_log, alpha_logscale=True)
    assert jnp.allclose(out_log, ref_log, atol=1e-5, rtol=1e-5)

    # Case 3: non-tile-multiple shape, bf16 I/O, multi-block ragged-edge grid.
    B2, C2, T2 = 2, 3, 200
    xb = jax.random.normal(k2, (B2, C2, T2), dtype=jnp.float32).astype(jnp.bfloat16)
    alpha2 = (0.5 + jax.random.uniform(k2, (C2,))).astype(jnp.float32)
    outb = jax.block_until_ready(snake(xb, alpha2, alpha_logscale=False))
    refb = snake_ref(xb, alpha2, alpha_logscale=False)
    assert outb.shape == (B2, C2, T2) and outb.dtype == jnp.bfloat16
    assert jnp.allclose(outb.astype(jnp.float32), refb.astype(jnp.float32),
                        atol=2e-2, rtol=2e-2)

    print("KERNEL_OK")
</pallas_src>

<mosaic_0001>
module attributes {stable_mosaic.version = 11 : i64} {
  func.func @_snake_kernel(%arg0: i32, %arg1: i32, %arg2: memref<8x128xf32, #tpu.memory_space<vmem>>, %arg3: memref<8x2xf32, #tpu.memory_space<vmem>>, %arg4: memref<8x128xf32, #tpu.memory_space<vmem>>) attributes {dimension_semantics = [#tpu.dimension_semantics<parallel>, #tpu.dimension_semantics<parallel>], iteration_bounds = array<i64: 1, 1>, scalar_prefetch = 0 : i64, scratch_operands = 0 : i64, tpu.core_type = #tpu.core_type<tc>, window_params = [{transform_indices = @transform_0, window_bounds = array<i64: 8, 128>}, {transform_indices = @transform_1, window_bounds = array<i64: 8, 2>}, {transform_indices = @transform_2, window_bounds = array<i64: 8, 128>}]} {
    %c0 = arith.constant 0 : index
    %c0_0 = arith.constant 0 : index
    %0 = vector.load %arg2[%c0, %c0_0] : memref<8x128xf32, #tpu.memory_space<vmem>>, vector<8x128xf32>
    %c0_1 = arith.constant 0 : index
    %c0_2 = arith.constant 0 : index
    %1 = vector.load %arg3[%c0_1, %c0_2] : memref<8x2xf32, #tpu.memory_space<vmem>>, vector<8x1xf32>
    %c0_3 = arith.constant 0 : index
    %c1 = arith.constant 1 : index
    %2 = vector.load %arg3[%c0_3, %c1] : memref<8x2xf32, #tpu.memory_space<vmem>>, vector<8x1xf32>
    %3 = vector.broadcast %1 : vector<8x1xf32> to vector<8x128xf32>
    %4 = arith.mulf %3, %0 : vector<8x128xf32>
    %5 = math.sin %4 : vector<8x128xf32>
    %6 = arith.mulf %5, %5 : vector<8x128xf32>
    %7 = vector.broadcast %2 : vector<8x1xf32> to vector<8x128xf32>
    %8 = arith.mulf %7, %6 : vector<8x128xf32>
    %9 = arith.addf %0, %8 : vector<8x128xf32>
    %c0_4 = arith.constant 0 : index
    %c0_5 = arith.constant 0 : index
    %10 = vector.load %arg4[%c0_4, %c0_5] : memref<8x128xf32, #tpu.memory_space<vmem>>, vector<8x128xf32>
    tpu.vector_store %arg4[%c0_4, %c0_5], %9 {strides = array<i32>} : memref<8x128xf32, #tpu.memory_space<vmem>>, vector<8x128xf32>,
    return
  }
  func.func @transform_0(%arg0: i32, %arg1: i32) -> (i32, i32) {
    %c0_i32 = arith.constant 0 : i32
    return %arg0, %arg1 : i32, i32
  }
  func.func @transform_1(%arg0: i32, %arg1: i32) -> (i32, i32) {
    %c0_i32 = arith.constant 0 : i32
    %c0_i32_0 = arith.constant 0 : i32
    return %arg0, %c0_i32 : i32, i32
  }
  func.func @transform_2(%arg0: i32, %arg1: i32) -> (i32, i32) {
    %c0_i32 = arith.constant 0 : i32
    return %arg0, %arg1 : i32, i32
  }
}

</mosaic_0001>

<bundles_post_ra>
// kernel: tpu_custom_call.1
= control target key start
LH: loop header
LB: loop body
LE: loop exit
PB: predicated region body
PF: predicated region fallthrough
CT: control target
= control target key end

     0   :  { %v191_v1 = vmov 0   ;;  %s249_s0 = inlined_call_operand.vmem [shape: f32[8,16], index: 0, kind: input, shape index: {}]   ;;  %s250_s1 = inlined_call_operand.vmem [shape: f32[8,2], index: 1, kind: input, shape index: {}]   ;;  %s251_s2 = inlined_call_operand.hbm [shape: f32[8,16], index: 2, kind: output, shape index: {}]  }
   0x1   :  { %v13_v0 = vld [vmem:[%s250_s1] sm:$0xff]  ;;  %163 = vset.pattern.permute.xlu0 %v191_v1 }
   0x2   :  { %16 = vperm.xlu0 %163, %v13_v0  }
   0x3   :  { %7 = vsyncpa [#allocation3], 0  ;;  %v192_v2 = vmov 1   ;;  %v221_v3 = vld [vmem:[%s249_s0] sm:$0xff]  ;;  %v193_v16 = vmov 683565275  }
   0x4   :  { %v194_v18 = vmov 2475754826   ;;  %v195_v21 = vmov 2131351028   ;;  %v196_v24 = vmov 2102212464  }
   0x5   :  { %v197_v27 = vmov 920167782   ;;  %v198_v30 = vmov 1326507024   ;;  %s199_s0 = smov [#allocation2]  }
   0x6   :  { %164 = vset.pattern.permute.xlu0 %v192_v2  ;;  %s138_s1 = sshll.u32 %s199_s0, 4  ;;  %s139_s1 = int_to_ptr.vmem [resolvable:$true] %s138_s1 }
   0x7   :  { %126 = vperm.xlu0 %164, %v13_v0   ;;  %s169_s13 = scalar_lea.vmem %s139_s1, 128  ;;  %p174_p1 = scmp.lt.s32.totalorder %s139_s1, %s139_s1 }
   0x8   :  { %p170_p0 = scmp.ne.s32.totalorder %s139_s1, %s169_s13  ;;  %p175_p2 = scmp.lt.s32.totalorder %s169_s13, %s169_s13 }
   0xa   :  { %p176_p3 = por %p175_p2, %p174_p1 }
   0xc   :  { %p177_p4 = pnand %p176_p3, %p170_p0 }
  0x7d   :  { %v17_v4 = vpop.permute.xlu0 %16 }
  0x7e   :  { %v224_v5 = vmul.f32 %v17_v4, %v221_v3 }
  0x80   :  { %v23_v6 = vand.u32 2139095040, %v224_v5  ;;  %v20_v10 = vand.u32 2147483647, %v224_v5  ;;  %vm22_vm7 = vcmp.lt.s32.totalorder %v224_v5, 0  ;;  %vm112_vm12 = vweird.f32 %v224_v5 }
  0x82   :  { %v24_v7 = vshrl.u32 %v23_v6, 23  ;;  %v27_v13 = vand.u32 8388607, %v20_v10  ;;  %vm21_vm8 = vcmp.le.f32.partialorder %v20_v10, 0.7853982 }
  0x84   :  { %v146_v8 = vadd.s32 4294967169, %v24_v7  ;;  %v28_v32 = vor.u32 8388608, %v27_v13 }
  0x86   :  { %v30_v9 = vadd.s32 1, %v146_v8  ;;  %v68_v46 = vshll.u32 %v28_v32, 8 }
  0x88   :  { %vm31_vm0 = vcmp.gt.s32.totalorder %v30_v9, 0 }
  0x89   :  { %v32_v11 = vsel %vm31_vm0, %v30_v9, 0 }
  0x8a   :  { %v34_v12 = vand.u32 31, %v32_v11  ;;  %v33_v15 = vshrl.u32 %v32_v11, 5 }
  0x8c   :  { %v35_v14 = vsub.s32 32, %v34_v12  ;;  %v37_v17 = vshll.u32 %v193_v16, %v34_v12  ;;  %v40_v19 = vshll.u32 %v194_v18, %v34_v12  ;;  %v43_v23 = vshll.u32 %v195_v21, %v34_v12 }
  0x8d   :  { %v46_v26 = vshll.u32 %v196_v24, %v34_v12  ;;  %v49_v29 = vshll.u32 %v197_v27, %v34_v12  ;;  %vm52_vm1 = vcmp.lt.s32.totalorder %v33_v15, 1  ;;  %vm55_vm2 = vcmp.lt.s32.totalorder %v33_v15, 4 }
  0x8e   :  { %v38_v20 = vshrl.u32 %v194_v18, %v35_v14  ;;  %v41_v22 = vshrl.u32 %v195_v21, %v35_v14  ;;  %v44_v25 = vshrl.u32 %v196_v24, %v35_v14  ;;  %v47_v28 = vshrl.u32 %v197_v27, %v35_v14 }
  0x8f   :  { %v50_v31 = vshrl.u32 %v198_v30, %v35_v14  ;;  %v36_v41 = vshrl.u32 %v193_v16, %v35_v14  ;;  %vm54_vm3 = vcmp.lt.s32.totalorder %v33_v15, 3  ;;  %vm53_vm4 = vcmp.lt.s32.totalorder %v33_v15, 2 }
  0x90   :  { %v39_v33 = vor.u32 %v38_v20, %v37_v17  ;;  %v42_v34 = vor.u32 %v41_v22, %v40_v19  ;;  %v45_v35 = vor.u32 %v44_v25, %v43_v23  ;;  %v48_v36 = vor.u32 %v47_v28, %v46_v26 }
  0x91   :  { %v51_v37 = vor.u32 %v50_v31, %v49_v29 }
  0x92   :  { %v57_v38 = vsel %vm55_vm2, %v45_v35, 2102212464  ;;  %v60_v39 = vsel %vm52_vm1, %v39_v33, %v42_v34  ;;  %v64_v40 = vsel %vm52_vm1, %v42_v34, %v45_v35  ;;  %v61_v42 = vsel %vm55_vm2, %v48_v36, 920167782 }
  0x93   :  { %v65_v43 = vsel %vm55_vm2, %v51_v37, 1326507024  ;;  %v62_v44 = vsel %vm54_vm3, %v45_v35, %v61_v42  ;;  %v56_v47 = vsel %vm52_vm1, %v36_v41, %v39_v33  ;;  %v58_v48 = vsel %vm54_vm3, %v42_v34, %v57_v38  ;;  %v127_v34 = vpop.permute.xlu0 %126 }
  0x94   :  { %v66_v45 = vsel %vm54_vm3, %v48_v36, %v65_v43  ;;  %v63_v49 = vsel %vm53_vm4, %v60_v39, %v62_v44  ;;  %v59_v55 = vsel %vm53_vm4, %v56_v47, %v58_v48 }
  0x95   :  { %v67_v50 = vsel %vm53_vm4, %v64_v40, %v66_v45  ;;  %v233_v53 = vmul.u32.u64.low %v68_v46, %v63_v49  ;;  %v234_v54 = vmul.u32.u64.high %v68_v46, %v63_v49, %v233_v53  ;;  %v75_v57 = vmul.u32 %v68_v46, %v59_v55 }
  0x96   :  { %v230_v51 = vmul.u32.u64.low %v68_v46, %v67_v50  ;;  %v231_v52 = vmul.u32.u64.high %v68_v46, %v67_v50, %v230_v51 }
  0x97   :  { %v78_v56 = vadd.s32 1, %v234_v54 }
  0x98   :  { %vm77_vm5 = vc.u32 %v231_v52, %v233_v53  ;;  %v76_v7 = vadd.s32 %v233_v53, %v231_v52 }
  0x99   :  { %v79_v58 = vsel %vm77_vm5, %v78_v56, %v234_v54 }
  0x9a   :  { %v80_v59 = vadd.s32 %v79_v58, %v75_v57 }
  0x9c   :  { %v81_v60 = vadd.s32 536870912, %v80_v59 }
  0x9e   :  { %v82_v61 = vshrl.u32 %v81_v60, 30 }
  0xa0   :  { %v83_v62 = vshll.u32 %v82_v61, 30  ;;  %v106_v21 = vsub.s32 4, %v82_v61 }
  0xa2   :  { %v84_v63 = vsub.s32 %v80_v59, %v83_v62  ;;  %v107_v24 = vsel %vm22_vm7, %v106_v21, %v82_v61 }
  0xa3   :  { %v109_v25 = vsel %vm21_vm8, 0, %v107_v24 }
  0xa4   :  { %v86_v0 = vsub.s32 0, %v84_v63  ;;  %v113_v26 = vadd.s32 3, %v109_v25 }
  0xa6   :  { %v147_v1 = vmin.u32 %v86_v0, %v84_v63  ;;  %v114_v27 = vand.u32 3, %v113_v26 }
  0xa8   :  { %v88_v2 = vclz %v147_v1  ;;  %vm119_vm9 = vcmp.eq.s32.totalorder %v114_v27, 2  ;;  %vm116_vm10 = vcmp.eq.s32.totalorder %v114_v27, 0  ;;  %vm115_vm11 = vcmp.lt.s32.totalorder %v114_v27, 2 }
  0xaa   :  { %v148_v4 = vadd.s32 4294967294, %v88_v2 }
  0xac   :  { %vm149_vm6 = vcmp.lt.s32.totalorder %v148_v4, 0 }
  0xad   :  { %v91_v6 = vsel %vm149_vm6, 0, %v148_v4 }
  0xae   :  { %v92_v8 = vsub.s32 32, %v91_v6  ;;  %v96_v9 = vsub.s32 4294967266, %v91_v6  ;;  %v93_v11 = vshll.u32 %v84_v63, %v91_v6 }
  0xb0   :  { %v94_v12 = vshrl.u32 %v76_v7, %v92_v8  ;;  %v97_v13 = vadd.s32 127, %v96_v9 }
  0xb2   :  { %v95_v14 = vor.u32 %v94_v12, %v93_v11  ;;  %v98_v15 = vshll.u32 %v97_v13, 23 }
  0xb4   :  { %v99_v16 = vor.u32 4788187, %v98_v15  ;;  %v102_v18 = vcvt.s32.f32 %v95_v14 }
  0xb6   :  { %v100_v17 = vand.u32 2147483647, %v99_v16 }
  0xb8   :  { %v103_v19 = vmul.f32 %v102_v18, %v100_v17 }
  0xba   :  { %v104_v20 = vxor.u32 2147483648, %v103_v19 }
  0xbc   :  { %v105_v22 = vsel %vm22_vm7, %v104_v20, %v103_v19 }
  0xbd   :  { %v108_v23 = vsel %vm21_vm8, %v224_v5, %v105_v22 }
  0xbe   :  { %165 = vcosq.f32 %v108_v23 }
  0xbf   :  { %167 = vsinq.f32 %v108_v23 }
  0xcb   :  { %v166_v28 = vpop.eup %165 }
  0xcc   :  { %v168_v29 = vpop.eup %167  ;;  %v120_v30 = vxor.u32 2147483648, %v166_v28 }
  0xcd   :  { %v117_v31 = vxor.u32 2147483648, %v168_v29 }
  0xce   :  { %v121_v32 = vsel %vm119_vm9, %v120_v30, %v168_v29 }
  0xcf   :  { %v118_v33 = vsel %vm116_vm10, %v166_v28, %v117_v31 }
  0xd0   :  { %v122_v10 = vsel %vm115_vm11, %v118_v33, %v121_v32 }
  0xd1   :  { %v123_v35 = vsel %vm112_vm12, nan, %v122_v10 }
  0xd2   :  { %v124_v36 = vmul.f32 %v123_v35, %v123_v35 }
  0xd4   :  { %v129_v37 = vmul.f32 %v127_v34, %v124_v36 }
  0xd6   :  { %v130_v38 = vadd.f32 %v129_v37, %v221_v3 }
  0xd8   :  { %131 = vst [vmem:[#allocation2] sm:$0xff] %v130_v38 }
  0xd9   :  { %180 = shalt.err (!%p177_p4)
}
  0xda   :  { %141 = dma.vmem_to_hbm [thread:$0]  %s139_s1, 128, %s251_s2, [#allocation3]  }
  0xdb   :  { %189 = dma.done.wait [#allocation3], 128  }
  0xdc   :  { %190 = vsyncadd [#allocation3], 4294967168 }
  0xdd   :  { %145 = vsyncpa [#allocation3], 1 }

</bundles_post_ra>
